<compile_context>
chip_gen: v7x
topology: tpu7x:2x2x1
jax: 0.10.0
libtpu: 0.0.40
codegen_flags: <defaults>
</compile_context>

<pallas_src>
import jax
import jax.numpy as jnp
import numpy as np
from jax.experimental import pallas as pl
from jax.experimental.pallas import tpu as pltpu


def _round_up(n, m):
    return ((n + m - 1) // m) * m


def _highway_kernel(x_ref, wf_ref, bf_ref, o_ref):
    # One grid step == one (row_tile, H) slab of flattened input rows.
    x = x_ref[...]                                    # (TR, H) f32 (kept for blend)
    xm = x.astype(wf_ref.dtype)                       # bf16 copy for the MXU
    pre = jnp.dot(xm, wf_ref[...],
                  preferred_element_type=jnp.float32) + bf_ref[...]   # (TR, 2H) f32
    h = pre.shape[-1] // 2
    y_pre = pre[:, :h]
    g_pre = pre[:, h:]
    y = jnp.tanh(y_pre)                               # EUP
    gate = 0.5 * jnp.tanh(0.5 * g_pre) + 0.5          # sigmoid via tanh (EUP, no divide)
    o_ref[...] = (y + gate * (x - y)).astype(o_ref.dtype)             # VPU blend


def _pick_row_tile(R, H, x_bytes, w_bytes, budget_bytes=48 * 1024 * 1024):
    """Pick the fattest row tile (multiple of 8, <= 512) that fits the VMEM budget."""
    # Resident, single-buffered fused weight + f32 bias.
    resident = H * (2 * H) * w_bytes + (2 * H) * 4
    # Per-row streaming cost: x tile (double-buffered), out tile (double-
    # buffered), plus ~3 f32 intermediates of width 2H inside the body.
    per_row = 2 * H * x_bytes + 2 * H * x_bytes + 3 * (2 * H) * 4
    avail = budget_bytes - resident - 4 * 1024 * 1024          # headroom
    rt = avail // per_row if avail > 0 else 8
    rt = int(max(8, min(512, (rt // 8) * 8)))
    # Never allocate a tile fatter than the (8-row rounded) input itself.
    rt = min(rt, _round_up(R, 8))
    return max(8, rt), resident, per_row


def highway(x, W1, b1, W2, b2, *, row_tile=None, matmul_dtype=jnp.bfloat16):
    """HighWay forward. x: (..., H). W1/W2 are [in, out] (transposed vs torch),
    b1/b2 are (1, H)."""
    orig_shape = x.shape
    H = orig_shape[-1]
    xf = x.reshape(-1, H)           # free reshape (contiguous last dim)
    R = xf.shape[0]

    # Fuse the two projections: one MXU stream, one resident weight buffer.
    # (In real use this concat/cast would be done once at parameter init.)
    Wf = jnp.concatenate([W1, W2], axis=1).astype(matmul_dtype)   # (H, 2H)
    bf = jnp.concatenate([b1, b2], axis=1).astype(jnp.float32)    # (1, 2H)

    x_bytes = jnp.dtype(x.dtype).itemsize
    w_bytes = jnp.dtype(matmul_dtype).itemsize
    auto_rt, resident, per_row = _pick_row_tile(R, H, x_bytes, w_bytes)
    if row_tile is None:
        row_tile = auto_rt
    row_tile = max(8, _round_up(row_tile, 8))

    num_tiles = pl.cdiv(R, row_tile)

    # Scoped-VMEM limit: cover the resident weights + this tiling with slack,
    # but stay under v7x's 64 MiB physical VMEM.
    est = resident + row_tile * per_row
    vmem_limit = int(min(60 * 1024 * 1024, max(32 * 1024 * 1024, 2 * est)))

    const_map = lambda i: (0, 0)
    out = pl.pallas_call(
        _highway_kernel,
        out_shape=jax.ShapeDtypeStruct((R, H), x.dtype),
        grid=(num_tiles,),
        in_specs=[
            pl.BlockSpec((row_tile, H), lambda i: (i, 0)),          # x row tile
            pl.BlockSpec((H, 2 * H), const_map,
                         pipeline_mode=pl.Buffered(1)),             # fused W (resident)
            pl.BlockSpec((1, 2 * H), const_map,
                         pipeline_mode=pl.Buffered(1)),             # fused bias (resident)
        ],
        out_specs=pl.BlockSpec((row_tile, H), lambda i: (i, 0)),
        compiler_params=pltpu.CompilerParams(
            dimension_semantics=("parallel",),                      # megacore on v7x
            vmem_limit_bytes=vmem_limit,
        ),
    )(xf, Wf, bf)

    return out.reshape(orig_shape)


def init_params(key, dim_hidden):
    # Mimic nn.Linear default init scale (uniform ~ 1/sqrt(fan_in)); exact
    # distribution is irrelevant for the forward-pass check.
    k1, k2, k3, k4 = jax.random.split(key, 4)
    bound = 1.0 / np.sqrt(dim_hidden)
    return {
        "W1": jax.random.uniform(k1, (dim_hidden, dim_hidden), jnp.float32, -bound, bound),
        "b1": jax.random.uniform(k2, (1, dim_hidden), jnp.float32, -bound, bound),
        "W2": jax.random.uniform(k3, (dim_hidden, dim_hidden), jnp.float32, -bound, bound),
        "b2": jax.random.uniform(k4, (1, dim_hidden), jnp.float32, -bound, bound),
    }


def reference(x, p):
    # Pure-JAX reference of the PyTorch forward for verification (f32 all the way).
    y = jnp.tanh(x @ p["W1"] + p["b1"][0])
    gate = jax.nn.sigmoid(x @ p["W2"] + p["b2"][0])
    return gate * x + (1.0 - gate) * y


if __name__ == "__main__":
    B, S, dim_hidden = 2, 8, 32

    key = jax.random.PRNGKey(0)
    k_x, k_p, k_x2 = jax.random.split(key, 3)
    x = jax.random.normal(k_x, (B, S, dim_hidden), dtype=jnp.float32)
    params = init_params(k_p, dim_hidden)
    args = (params["W1"], params["b1"], params["W2"], params["b2"])

    # 1) Default (bf16 matmul) path.
    out = highway(x, *args)
    out = jax.block_until_ready(out)
    ref = reference(x, params)
    np.testing.assert_allclose(np.asarray(out), np.asarray(ref),
                               rtol=5e-2, atol=5e-2)
    assert out.shape == (B, S, dim_hidden)

    # 2) f32 matmul path, tight tolerance.
    out_f32 = highway(x, *args, matmul_dtype=jnp.float32)
    out_f32 = jax.block_until_ready(out_f32)
    np.testing.assert_allclose(np.asarray(out_f32), np.asarray(ref),
                               rtol=1e-5, atol=1e-5)

    # 3) Ragged row count (not a multiple of 8) -> exercises the masked tail
    #    block with no host-side padding.
    x_odd = jax.random.normal(k_x2, (3, 5, dim_hidden), dtype=jnp.float32)
    out_odd = highway(x_odd, *args, matmul_dtype=jnp.float32)
    out_odd = jax.block_until_ready(out_odd)
    np.testing.assert_allclose(np.asarray(out_odd),
                               np.asarray(reference(x_odd, params)),
                               rtol=1e-5, atol=1e-5)

    print("KERNEL_OK")
</pallas_src>

<mosaic_0001>
module attributes {stable_mosaic.version = 11 : i64} {
  func.func @_highway_kernel(%arg0: i32, %arg1: memref<16x32xf32, #tpu.memory_space<vmem>>, %arg2: memref<32x64xbf16, #tpu.memory_space<vmem>>, %arg3: memref<1x64xf32, #tpu.memory_space<vmem>>, %arg4: memref<16x32xf32, #tpu.memory_space<vmem>>) attributes {dimension_semantics = [#tpu.dimension_semantics<parallel>], iteration_bounds = array<i64: 1>, scalar_prefetch = 0 : i64, scratch_operands = 0 : i64, tpu.core_type = #tpu.core_type<tc>, window_params = [{transform_indices = @transform_0, window_bounds = array<i64: 16, 32>}, {pipeline_mode = #tpu.pipeline_mode<synchronous>, transform_indices = @transform_1, window_bounds = array<i64: 32, 64>}, {pipeline_mode = #tpu.pipeline_mode<synchronous>, transform_indices = @transform_2, window_bounds = array<i64: 1, 64>}, {transform_indices = @transform_3, window_bounds = array<i64: 16, 32>}]} {
    %c0 = arith.constant 0 : index
    %c0_0 = arith.constant 0 : index
    %0 = vector.load %arg1[%c0, %c0_0] : memref<16x32xf32, #tpu.memory_space<vmem>>, vector<16x32xf32>
    %1 = arith.truncf %0 : vector<16x32xf32> to vector<16x32xbf16>
    %c0_1 = arith.constant 0 : index
    %c0_2 = arith.constant 0 : index
    %2 = vector.load %arg2[%c0_1, %c0_2] : memref<32x64xbf16, #tpu.memory_space<vmem>>, vector<32x64xbf16>
    %cst = arith.constant dense<0.000000e+00> : vector<16x64xf32>
    %3 = tpu.matmul %1, %2, %cst {dimension_numbers = #tpu.dot_dimension_numbers<[1], [0], [0], [1], [0, 0, 1, 1], [], []>} : vector<16x32xbf16>, vector<32x64xbf16>, vector<16x64xf32> -> vector<16x64xf32>
    %c0_3 = arith.constant 0 : index
    %c0_4 = arith.constant 0 : index
    %4 = vector.load %arg3[%c0_3, %c0_4] : memref<1x64xf32, #tpu.memory_space<vmem>>, vector<1x64xf32>
    %5 = vector.broadcast %4 : vector<1x64xf32> to vector<16x64xf32>
    %6 = arith.addf %3, %5 : vector<16x64xf32>
    %7 = vector.extract_strided_slice %6 {offsets = [0, 0], sizes = [16, 32], strides = [1, 1]} : vector<16x64xf32> to vector<16x32xf32>
    %8 = vector.extract_strided_slice %6 {offsets = [0, 32], sizes = [16, 32], strides = [1, 1]} : vector<16x64xf32> to vector<16x32xf32>
    %9 = math.tanh %7 : vector<16x32xf32>
    %cst_5 = arith.constant 5.000000e-01 : f32
    %10 = vector.broadcast %cst_5 : f32 to vector<16x32xf32>
    %11 = arith.mulf %10, %8 : vector<16x32xf32>
    %12 = math.tanh %11 : vector<16x32xf32>
    %cst_6 = arith.constant 5.000000e-01 : f32
    %13 = vector.broadcast %cst_6 : f32 to vector<16x32xf32>
    %14 = arith.mulf %13, %12 : vector<16x32xf32>
    %cst_7 = arith.constant 5.000000e-01 : f32
    %15 = vector.broadcast %cst_7 : f32 to vector<16x32xf32>
    %16 = arith.addf %14, %15 : vector<16x32xf32>
    %17 = arith.subf %0, %9 : vector<16x32xf32>
    %18 = arith.mulf %16, %17 : vector<16x32xf32>
    %19 = arith.addf %9, %18 : vector<16x32xf32>
    %c0_8 = arith.constant 0 : index
    %c0_9 = arith.constant 0 : index
    %20 = vector.load %arg4[%c0_8, %c0_9] : memref<16x32xf32, #tpu.memory_space<vmem>>, vector<16x32xf32>
    tpu.vector_store %arg4[%c0_8, %c0_9], %19 {strides = array<i32>} : memref<16x32xf32, #tpu.memory_space<vmem>>, vector<16x32xf32>,
    return
  }
  func.func @transform_0(%arg0: i32) -> (i32, i32) {
    %c0_i32 = arith.constant 0 : i32
    %c0_i32_0 = arith.constant 0 : i32
    return %arg0, %c0_i32 : i32, i32
  }
  func.func @transform_1(%arg0: i32) -> (i32, i32) {
    %c0_i32 = arith.constant 0 : i32
    %c0_i32_0 = arith.constant 0 : i32
    %c0_i32_1 = arith.constant 0 : i32
    return %c0_i32, %c0_i32_0 : i32, i32
  }
  func.func @transform_2(%arg0: i32) -> (i32, i32) {
    %c0_i32 = arith.constant 0 : i32
    %c0_i32_0 = arith.constant 0 : i32
    %c0_i32_1 = arith.constant 0 : i32
    return %c0_i32, %c0_i32_0 : i32, i32
  }
  func.func @transform_3(%arg0: i32) -> (i32, i32) {
    %c0_i32 = arith.constant 0 : i32
    %c0_i32_0 = arith.constant 0 : i32
    return %arg0, %c0_i32 : i32, i32
  }
}

</mosaic_0001>

<bundles_post_ra>
// kernel: tpu_custom_call.1
= control target key start
LH: loop header
LB: loop body
LE: loop exit
PB: predicated region body
PF: predicated region fallthrough
CT: control target
= control target key end

     0   :  { %8 = vsyncpa [#allocation3], 0  ;;  %s354_s0 = inlined_call_operand.hbm [shape: f32[16,32], index: 0, kind: input, shape index: {}]   ;;  %s355_s1 = inlined_call_operand.hbm [shape: bf16[32,64], index: 1, kind: input, shape index: {}]   ;;  %s356_s2 = inlined_call_operand.vmem [shape: f32[1,64], index: 2, kind: input, shape index: {}]   ;;  %s357_s3 = inlined_call_operand.hbm [shape: f32[16,32], index: 3, kind: output, shape index: {}]  }
   0x1   :  { %9 = vsyncpa [#allocation6], 0 }
   0x2   :  { %10 = vsyncpa [#allocation4], 0  ;;  %s275_s12 = smov [#allocation2]   ;;  %s203_s16 = scalar_lea.hbm %s354_s0, 256 }
   0x3   :  { %s16_s13 = sshll.u32 %s275_s12, 4  ;;  %p204_p0 = scmp.ne.s32.totalorder %s354_s0, %s203_s16  ;;  %s17_s13 = int_to_ptr.vmem [resolvable:$true] %s16_s13 }
   0x4   :  { %p207_p1 = scmp.lt.u32.totalorder %s203_s16, %s354_s0 }
   0x6   :  { %p209_p2 = pnand %p207_p1, %p204_p0 }
   0x8   :  { %212 = shalt.err (!%p209_p2)
}
   0x9   :  { %s213_s21 = scalar_lea.vmem %s17_s13, 256  ;;  %p218_p4 = scmp.lt.s32.totalorder %s17_s13, %s17_s13 }
   0xa   :  { %p214_p3 = scmp.ne.s32.totalorder %s17_s13, %s213_s21  ;;  %p219_p5 = scmp.lt.s32.totalorder %s213_s21, %s213_s21 }
   0xc   :  { %p220_p6 = por %p219_p5, %p218_p4 }
   0xe   :  { %p221_p7 = pnand %p220_p6, %p214_p3 }
  0x10   :  { %224 = shalt.err (!%p221_p7)
}
  0x11   :  { %s276_s22 = smov 128   ;;  %s277_s23 = smov 8  }
  0x12   :  { %22 = dma.hbm_to_vmem [thread:$0]  %s354_s0, 256, %s17_s13, [#allocation3], %s276_s22, %s276_s22, %s277_s23  }
  0x13   :  { %s278_s26 = smov [#allocation5]   ;;  %s225_s30 = scalar_lea.hbm %s355_s1, 256 }
  0x14   :  { %s28_s27 = sshll.u32 %s278_s26, 4  ;;  %p226_p8 = scmp.ne.s32.totalorder %s355_s1, %s225_s30  ;;  %s29_s27 = int_to_ptr.vmem [resolvable:$true] %s28_s27 }
  0x15   :  { %p229_p9 = scmp.lt.u32.totalorder %s225_s30, %s355_s1 }
  0x17   :  { %p231_p10 = pnand %p229_p9, %p226_p8 }
  0x19   :  { %234 = shalt.err (!%p231_p10)
}
  0x1a   :  { %s235_s8 = scalar_lea.vmem %s29_s27, 256  ;;  %p240_p12 = scmp.lt.s32.totalorder %s29_s27, %s29_s27 }
  0x1b   :  { %p236_p11 = scmp.ne.s32.totalorder %s29_s27, %s235_s8  ;;  %p241_p13 = scmp.lt.s32.totalorder %s235_s8, %s235_s8 }
  0x1d   :  { %p242_p0 = por %p241_p13, %p240_p12 }
  0x1f   :  { %p243_p1 = pnand %p242_p0, %p236_p11 }
  0x21   :  { %246 = shalt.err (!%p243_p1)
}
  0x22   :  { %s279_s0 = smov 64   ;;  %s280_s9 = smov 4  }
  0x23   :  { %34 = dma.hbm_to_vmem [thread:$0]  %s355_s1, 256, %s29_s27, [#allocation6], %s279_s0, %s279_s0, %s280_s9  }
  0x24   :  { %269 = dma.done.wait [#allocation3], 256  }
  0x25   :  { %270 = vsyncadd [#allocation3], 4294967040 }
  0x26   :  { %271 = dma.done.wait [#allocation6], 256  }
  0x27   :  { %272 = vsyncadd [#allocation6], 4294967040  ;;  %v281_v0 = vmov 0.0   ;;  %vm282_vm0 = vmmov 0   ;;  %v193_v1 = vld [vmem:[#allocation5] sm:$0xff]   ;;  %v194_v2 = vld [vmem:[#allocation5 + $0x8] sm:$0xff]  }
  0x28   :  { %174 = vmatprep.subr.bf16.mxu0 %v281_v0  ;;  %178 = vmatprep.mubr.msk.bf16.mxu0 %vm282_vm0, %v281_v0  ;;  %v44_v3 = vld [vmem:[#allocation2] sm:$0xff]  ;;  %v45_v4 = vld [vmem:[#allocation2 + $0x8] sm:$0xff]  ;;  %vm70_vm1 = vcmask 261120   ;;  %s283_s13 = smov 32   ;;  %s285_s14 = smov [#allocation7]  }
  0x29   :  { %175 = vmatpush3.bf16.msra.mxu0 %v193_v1  ;;  %v46_v5 = vpack.c.bf16 %v45_v4, %v44_v3  ;;  %v167_v6 = vld [vmem:[%s356_s2] ss:$0 sm:$0xff]  ;;  %s284_s2 = smov 96   ;;  %s154_s15 = sshll.u32 %s285_s14, 4  ;;  %s155_s15 = int_to_ptr.vmem [resolvable:$true] %s154_s15 }
  0x2a   :  { %176 = vmatprep.subr.bf16.mxu0 %v281_v0  ;;  %s247_s16 = scalar_lea.vmem %s155_s15, 256  ;;  %p252_p3 = scmp.lt.s32.totalorder %s155_s15, %s155_s15 }
  0x2b   :  { %p248_p2 = scmp.ne.s32.totalorder %s155_s15, %s247_s16  ;;  %p253_p4 = scmp.lt.s32.totalorder %s247_s16, %s247_s16 }
  0x2d   :  { %177 = vmatpush3.bf16.msra.mxu0 %v194_v2  ;;  %p254_p5 = por %p253_p4, %p252_p3 }
  0x2f   :  { %p255_p6 = pnand %p254_p5, %p248_p2 }
  0x30   :  { %179 = vmatmul.mubr.msk.bf16.vlgmr.msra.gmra.mrb[0].mxu0 %vm70_vm1, %v46_v5 }
 0x103   :  { %v108_v7 = vpop.f32.mrb[0].mxu0 }
 0x104   :  { %v109_v8 = vadd.f32 %v167_v6, %v108_v7  ;;  %v180_v9 = vpop.f32.mrb[1].mxu0 }
 0x105   :  { %v111_v10 = vpop.f32.mrb[2].mxu0 }
 0x106   :  { %195 = vtanh.f32 %v109_v8  ;;  %v112_v11 = vadd.f32 %v167_v6, %v111_v10  ;;  %v181_v12 = vpop.f32.mrb[3].mxu0  ;;  %v117_v17 = vmul.f32 0.5, %v109_v8 }
 0x108   :  { %197 = vtanh.f32 %v112_v11  ;;  %v118_v18 = vmul.f32 0.5, %v112_v11 }
 0x109   :  { %199 = vtanh.f32 %v117_v17 }
 0x10a   :  { %201 = vtanh.f32 %v118_v18 }
 0x110   :  { %v196_v13 = vpop.eup %195 }
 0x111   :  { %v125_v14 = vsub.f32 %v44_v3, %v196_v13 }
 0x112   :  { %v198_v15 = vpop.eup %197 }
 0x113   :  { %129 = vrot.lane.b32.xlu0 %v125_v14, %s283_s13  ;;  %v126_v16 = vsub.f32 %v45_v4, %v198_v15  ;;  %v200_v19 = vpop.eup %199 }
 0x114   :  { %v121_v20 = vmul.f32 0.5, %v200_v19  ;;  %v202_v21 = vpop.eup %201 }
 0x115   :  { %v122_v23 = vmul.f32 0.5, %v202_v21 }
 0x116   :  { %v123_v22 = vadd.f32 0.5, %v121_v20 }
 0x117   :  { %131 = vrot.lane.b32.xlu0 %v126_v16, %s283_s13  ;;  %v124_v26 = vadd.f32 0.5, %v122_v23 }
 0x185   :  { %v130_v24 = vpop.permute.xlu0 %129 }
 0x186   :  { %v135_v25 = vmul.f32 %v130_v24, %v123_v22 }
 0x188   :  { %139 = vrot.lane.b32.xlu1 %v135_v25, %s284_s2 }
 0x189   :  { %v132_v27 = vpop.permute.xlu0 %131 }
 0x18a   :  { %v136_v28 = vmul.f32 %v132_v27, %v124_v26 }
 0x18c   :  { %141 = vrot.lane.b32.xlu1 %v136_v28, %s284_s2 }
 0x1fa   :  { %v140_v29 = vpop.permute.xlu1 %139 }
 0x1fb   :  { %v145_v30 = vadd.f32 %v196_v13, %v140_v29 }
 0x1fd   :  { %147 = vst.msk [vmem:[#allocation7] sm:$0xff] %vm70_vm1, %v145_v30 }
 0x1fe   :  { %v142_v31 = vpop.permute.xlu1 %141 }
 0x1ff   :  { %v146_v32 = vadd.f32 %v198_v15, %v142_v31 }
 0x201   :  { %148 = vst.msk [vmem:[#allocation7 + $0x8] sm:$0xff] %vm70_vm1, %v146_v32 }
 0x202   :  { %258 = shalt.err (!%p255_p6)
}
 0x203   :  { %s259_s19 = scalar_lea.hbm %s357_s3, 256 }
 0x204   :  { %p260_p7 = scmp.ne.s32.totalorder %s357_s3, %s259_s19  ;;  %p263_p8 = scmp.lt.u32.totalorder %s259_s19, %s357_s3 }
 0x206   :  { %p265_p9 = pnand %p263_p8, %p260_p7 }
 0x208   :  { %268 = shalt.err (!%p265_p9)
}
 0x209   :  { %160 = dma.vmem_to_hbm [thread:$0]  %s155_s15, 256, %s357_s3, [#allocation4], %s276_s22, %s276_s22, %s277_s23  }
 0x20a   :  { %273 = dma.done.wait [#allocation4], 256  }
 0x20b   :  { %274 = vsyncadd [#allocation4], 4294967040 }
 0x20c   :  { %164 = vsyncpa [#allocation3], 1 }
 0x20d   :  { %165 = vsyncpa [#allocation6], 1 }
 0x20e   :  { %166 = vsyncpa [#allocation4], 1 }

</bundles_post_ra>
